<compile_context>
chip_gen: v6e
topology: v6e:2x2x1
jax: 0.10.0
libtpu: 0.0.40
codegen_flags: <defaults>
</compile_context>

<pallas_src>
import functools
import math

import jax
import jax.numpy as jnp
from jax.experimental import pallas as pl
from jax.experimental.pallas import tpu as pltpu


def bert_att_forward(inp, hidden):
    """Exact reproduction of the PyTorch BertAtt.forward semantics (body is `pass`)."""
    # TODO(synk): reference forward body is `pass` (returns None); nothing to compute.
    return None


# --------------------------------------------------------------------------- #
# Kernel
# --------------------------------------------------------------------------- #
def _flash_attn_kernel(hid_ref, inp_ref, out_ref, q_sc, m_sc, l_sc, acc_sc, *,
                       scale, kv_len, tk, need_mask):
    # hid_ref: (bblk, tq, D) queries, inp_ref: (bblk, tk, D) keys/values.
    kv = pl.program_id(2)

    @pl.when(kv == 0)
    def _():
        # Hoist the 1/sqrt(D) scaling out of the kv loop: the hidden block is
        # resident across the kv axis, so scale it once per (batch, q-tile)
        # instead of S/tk times (biggest relative win on v5e, no bf16 VALU).
        q_sc[...] = hid_ref[...] * jnp.asarray(scale, hid_ref.dtype)
        m_sc[...] = jnp.full_like(m_sc, -jnp.inf)
        l_sc[...] = jnp.zeros_like(l_sc)
        acc_sc[...] = jnp.zeros_like(acc_sc)

    q = q_sc[...]
    k = inp_ref[...]
    v = inp_ref[...]

    # Batched contraction along D (no explicit k.T / XLU transpose); f32 accumulate.
    s = jnp.einsum("bqd,bkd->bqk", q, k, preferred_element_type=jnp.float32)

    if need_mask:
        # Sequence was padded to a tile multiple: mask out padded keys.
        key_idx = kv * tk + jax.lax.broadcasted_iota(jnp.int32, s.shape, 2)
        s = jnp.where(key_idx < kv_len, s, jnp.float32(-1e30))

    # Online (numerically stable) softmax, statistics in f32.
    m_prev = m_sc[...]
    m_new = jnp.maximum(m_prev, s.max(axis=-1, keepdims=True))
    alpha = jnp.exp(m_prev - m_new)
    p = jnp.exp(s - m_new)
    l_sc[...] = alpha * l_sc[...] + p.sum(axis=-1, keepdims=True)
    # Probabilities back to the value dtype so the PV matmul runs at native MXU
    # width; accumulate in f32 scratch.
    acc_sc[...] = alpha * acc_sc[...] + jnp.einsum(
        "bqk,bkd->bqd", p.astype(v.dtype), v, preferred_element_type=jnp.float32
    )
    m_sc[...] = m_new

    @pl.when(kv == pl.num_programs(2) - 1)
    def _():
        inv_l = pl.reciprocal(l_sc[...], approx=True)  # EUP slot, off the VALU path
        out_ref[...] = (acc_sc[...] * inv_l).astype(out_ref.dtype)


# --------------------------------------------------------------------------- #
# Tiling / VMEM planning
# --------------------------------------------------------------------------- #
def _round_up(x, m):
    return ((x + m - 1) // m) * m


def _vmem_capacity_bytes():
    try:
        return int(pltpu.get_tpu_info().vmem_capacity_bytes)
    except Exception:
        return 64 * 1024 * 1024  # conservative (v7x per-TC VMEM)


def _ws_bytes(bblk, tq, tk, d, itemsize):
    """Rough resident-set estimate for one grid step."""
    io = 2 * bblk * (2 * tq + tk) * d * itemsize      # double-buffered hidden/out + inp blocks
    q_scr = bblk * tq * d * itemsize                  # scaled-q scratch
    acc = bblk * tq * d * 4                           # f32 output accumulator
    ml = 2 * bblk * tq * 128 * 4                      # m/l scratch (lane-padded)
    scores = 3 * bblk * tq * tk * 4                   # s / p / exp f32 temporaries
    return io + q_scr + acc + ml + scores


def _plan(B, S, D, itemsize, budget):
    """Pick (bblk, tq, tk, s_pad, d_pad, need_mask) under a VMEM byte budget."""
    d_pad = _round_up(D, 128)  # lane-dense contraction / output stores

    if S <= 256:
        # One tile covers the whole (small) sequence: full-extent blocks,
        # no padding, no key mask.
        tq = tk = S
        s_pad = S
    else:
        s_ceil = _round_up(S, 128)
        tq_cands = [t for t in (512, 256, 128) if t <= s_ceil] or [128]
        tk_cands = [t for t in (256, 128) if t <= s_ceil] or [128]
        tq, tk = 128, 128
        # Prefer the largest tq that fits (raises arithmetic intensity per K/V
        # byte), then the largest MXU-aligned tk (fewer online-softmax rescales).
        found = False
        for cq in tq_cands:
            for ck in tk_cands:
                if _ws_bytes(1, cq, ck, d_pad, itemsize) <= budget:
                    tq, tk = cq, ck
                    found = True
                    break
            if found:
                break
        # Tile values are powers of two, so lcm(tq, tk) == max(tq, tk).
        s_pad = _round_up(S, max(tq, tk))

    # Prefer spending VMEM on tq over bblk; keep enough parallel grid steps for
    # megacore sharding on v7x.
    bblk = 1
    if (B % 2 == 0
            and _ws_bytes(2, tq, tk, d_pad, itemsize) <= budget
            and (B // 2) * max(1, s_pad // tq) >= 2):
        bblk = 2

    return bblk, tq, tk, s_pad, d_pad, (s_pad != S)


# --------------------------------------------------------------------------- #
# Wrapper
# --------------------------------------------------------------------------- #
def bert_att_pallas(inp, hidden):
    """Parameter-free attention hot path implied by the BertAtt module name/signature."""
    assert inp.shape == hidden.shape and inp.ndim == 3
    B, S, D = inp.shape
    scale = 1.0 / math.sqrt(D)  # true D, independent of lane padding
    itemsize = jnp.dtype(inp.dtype).itemsize

    vmem_cap = _vmem_capacity_bytes()
    budget = int(vmem_cap * 0.7)
    bblk, tq, tk, s_pad, d_pad, need_mask = _plan(B, S, D, itemsize, budget)
    assert B % bblk == 0 and s_pad % tq == 0 and s_pad % tk == 0

    # Explicit scoped-VMEM budget: defaults (16 MiB v5e, 32 MiB v6e/v7x) are far
    # below physical VMEM and would block the larger tiles selected above.
    ws = _ws_bytes(bblk, tq, tk, d_pad, itemsize)
    vmem_limit = int(min(vmem_cap * 0.85, max(ws * 2, vmem_cap * 0.5)))

    # Pad to lane-dense D and tile-multiple S (zero padding; keys masked in-kernel,
    # padded rows/cols sliced off below).
    if s_pad != S or d_pad != D:
        pad = ((0, 0), (0, s_pad - S), (0, d_pad - D))
        inp_p = jnp.pad(inp, pad)
        hid_p = jnp.pad(hidden, pad)
    else:
        inp_p, hid_p = inp, hidden

    kernel = functools.partial(
        _flash_attn_kernel, scale=scale, kv_len=S, tk=tk, need_mask=need_mask
    )

    grid_spec = pltpu.PrefetchScalarGridSpec(
        num_scalar_prefetch=0,
        grid=(B // bblk, s_pad // tq, s_pad // tk),
        in_specs=[
            pl.BlockSpec((bblk, tq, d_pad), lambda b, qi, ki: (b, qi, 0)),  # hidden -> q
            pl.BlockSpec((bblk, tk, d_pad), lambda b, qi, ki: (b, ki, 0)),  # inp    -> k,v
            # NOTE: pipeline_mode=pl.Buffered(3) on the inp spec only if xprof
            # shows exposed K/V DMA at q-tile boundaries (needs VMEM headroom).
        ],
        out_specs=pl.BlockSpec((bblk, tq, d_pad), lambda b, qi, ki: (b, qi, 0)),
        scratch_shapes=[
            pltpu.VMEM((bblk, tq, d_pad), inp.dtype),    # scaled q (hoisted)
            pltpu.VMEM((bblk, tq, 1), jnp.float32),      # running max
            pltpu.VMEM((bblk, tq, 1), jnp.float32),      # running sum
            pltpu.VMEM((bblk, tq, d_pad), jnp.float32),  # output accumulator
        ],
    )

    out = pl.pallas_call(
        kernel,
        out_shape=jax.ShapeDtypeStruct((B, s_pad, d_pad), inp.dtype),
        grid_spec=grid_spec,
        compiler_params=pltpu.CompilerParams(
            dimension_semantics=("parallel", "parallel", "arbitrary"),
            vmem_limit_bytes=vmem_limit,
        ),
    )(hid_p, inp_p)

    if s_pad != S or d_pad != D:
        out = out[:, :S, :D]
    return out


# --------------------------------------------------------------------------- #
# Reference + demo
# --------------------------------------------------------------------------- #
def _attention_reference(inp, hidden):
    q = hidden.astype(jnp.float32)
    k = inp.astype(jnp.float32)
    v = inp.astype(jnp.float32)
    scale = 1.0 / math.sqrt(inp.shape[-1])
    scores = jnp.einsum("bqd,bkd->bqk", q, k) * scale
    p = jax.nn.softmax(scores, axis=-1)
    return jnp.einsum("bqk,bkd->bqd", p, v)


if __name__ == "__main__":
    key = jax.random.PRNGKey(0)
    k1, k2 = jax.random.split(key)

    B, S, D = 2, 8, 32
    inp = jax.random.normal(k1, (B, S, D), dtype=jnp.float32).astype(jnp.bfloat16)
    hidden = jax.random.normal(k2, (B, S, D), dtype=jnp.float32).astype(jnp.bfloat16)

    # Faithful forward (matches the PyTorch stub: returns None).
    faithful = bert_att_forward(inp, hidden)
    assert faithful is None

    # Run the Pallas attention hot path and validate against a pure-JAX reference.
    out = bert_att_pallas(inp, hidden)
    jax.block_until_ready(out)
    assert out.shape == (B, S, D)
    assert out.dtype == inp.dtype
    assert bool(jnp.all(jnp.isfinite(out.astype(jnp.float32))))

    ref = _attention_reference(inp, hidden)
    err = jnp.max(jnp.abs(out.astype(jnp.float32) - ref))
    assert bool(err < 0.1), f"max abs error {err}"

    print("KERNEL_OK")
</pallas_src>

<mosaic_0001>
module attributes {stable_mosaic.version = 11 : i64} {
  func.func @_flash_attn_kernel(%arg0: i32, %arg1: i32, %arg2: i32, %arg3: memref<1x8x128xbf16, #tpu.memory_space<vmem>>, %arg4: memref<1x8x128xbf16, #tpu.memory_space<vmem>>, %arg5: memref<1x8x128xbf16, #tpu.memory_space<vmem>>, %arg6: memref<1x8x128xbf16, #tpu.memory_space<vmem>>, %arg7: memref<1x8x1xf32, #tpu.memory_space<vmem>>, %arg8: memref<1x8x1xf32, #tpu.memory_space<vmem>>, %arg9: memref<1x8x128xf32, #tpu.memory_space<vmem>>) attributes {dimension_semantics = [#tpu.dimension_semantics<parallel>, #tpu.dimension_semantics<parallel>, #tpu.dimension_semantics<arbitrary>], iteration_bounds = array<i64: 2, 1, 1>, scalar_prefetch = 0 : i64, scratch_operands = 4 : i64, tpu.core_type = #tpu.core_type<tc>, window_params = [{transform_indices = @transform_0, window_bounds = array<i64: 1, 8, 128>}, {transform_indices = @transform_1, window_bounds = array<i64: 1, 8, 128>}, {transform_indices = @transform_2, window_bounds = array<i64: 1, 8, 128>}]} {
    %c0_i32 = arith.constant 0 : i32
    %0 = arith.cmpi eq, %arg2, %c0_i32 : i32
    %1 = arith.extui %0 : i1 to i32
    %c0_i32_0 = arith.constant 0 : i32
    %2 = arith.cmpi ne, %1, %c0_i32_0 : i32
    scf.if %2 {
      %c0_32 = arith.constant 0 : index
      %c0_33 = arith.constant 0 : index
      %c0_34 = arith.constant 0 : index
      %33 = vector.load %arg3[%c0_32, %c0_33, %c0_34] : memref<1x8x128xbf16, #tpu.memory_space<vmem>>, vector<1x8x128xbf16>
      %cst_35 = arith.constant 1.767580e-01 : bf16
      %34 = vector.broadcast %cst_35 : bf16 to vector<1x8x128xbf16>
      %35 = arith.mulf %33, %34 : vector<1x8x128xbf16>
      %c0_36 = arith.constant 0 : index
      %c0_37 = arith.constant 0 : index
      %c0_38 = arith.constant 0 : index
      %36 = vector.load %arg6[%c0_36, %c0_37, %c0_38] : memref<1x8x128xbf16, #tpu.memory_space<vmem>>, vector<1x8x128xbf16>
      tpu.vector_store %arg6[%c0_36, %c0_37, %c0_38], %35 {strides = array<i32>} : memref<1x8x128xbf16, #tpu.memory_space<vmem>>, vector<1x8x128xbf16>,
      %cst_39 = arith.constant 0xFF800000 : f32
      %37 = vector.broadcast %cst_39 : f32 to vector<1x8x1xf32>
      %c0_40 = arith.constant 0 : index
      %c0_41 = arith.constant 0 : index
      %c0_42 = arith.constant 0 : index
      %38 = vector.load %arg7[%c0_40, %c0_41, %c0_42] : memref<1x8x1xf32, #tpu.memory_space<vmem>>, vector<1x8x1xf32>
      tpu.vector_store %arg7[%c0_40, %c0_41, %c0_42], %37 {strides = array<i32>} : memref<1x8x1xf32, #tpu.memory_space<vmem>>, vector<1x8x1xf32>,
      %cst_43 = arith.constant 0.000000e+00 : f32
      %39 = vector.broadcast %cst_43 : f32 to vector<1x8x1xf32>
      %c0_44 = arith.constant 0 : index
      %c0_45 = arith.constant 0 : index
      %c0_46 = arith.constant 0 : index
      %40 = vector.load %arg8[%c0_44, %c0_45, %c0_46] : memref<1x8x1xf32, #tpu.memory_space<vmem>>, vector<1x8x1xf32>
      tpu.vector_store %arg8[%c0_44, %c0_45, %c0_46], %39 {strides = array<i32>} : memref<1x8x1xf32, #tpu.memory_space<vmem>>, vector<1x8x1xf32>,
      %cst_47 = arith.constant 0.000000e+00 : f32
      %41 = vector.broadcast %cst_47 : f32 to vector<1x8x128xf32>
      %c0_48 = arith.constant 0 : index
      %c0_49 = arith.constant 0 : index
      %c0_50 = arith.constant 0 : index
      %42 = vector.load %arg9[%c0_48, %c0_49, %c0_50] : memref<1x8x128xf32, #tpu.memory_space<vmem>>, vector<1x8x128xf32>
      tpu.vector_store %arg9[%c0_48, %c0_49, %c0_50], %41 {strides = array<i32>} : memref<1x8x128xf32, #tpu.memory_space<vmem>>, vector<1x8x128xf32>,
    } else {
    }
    %c0 = arith.constant 0 : index
    %c0_1 = arith.constant 0 : index
    %c0_2 = arith.constant 0 : index
    %3 = vector.load %arg6[%c0, %c0_1, %c0_2] : memref<1x8x128xbf16, #tpu.memory_space<vmem>>, vector<1x8x128xbf16>
    %c0_3 = arith.constant 0 : index
    %c0_4 = arith.constant 0 : index
    %c0_5 = arith.constant 0 : index
    %4 = vector.load %arg4[%c0_3, %c0_4, %c0_5] : memref<1x8x128xbf16, #tpu.memory_space<vmem>>, vector<1x8x128xbf16>
    %c0_6 = arith.constant 0 : index
    %c0_7 = arith.constant 0 : index
    %c0_8 = arith.constant 0 : index
    %5 = vector.load %arg4[%c0_6, %c0_7, %c0_8] : memref<1x8x128xbf16, #tpu.memory_space<vmem>>, vector<1x8x128xbf16>
    "tpu.trace_start"() <{level = 10 : i32, message = "bqd,bkd->bqk"}> : () -> ()
    %cst = arith.constant dense<0.000000e+00> : vector<1x8x8xf32>
    %6 = tpu.matmul %3, %4, %cst {dimension_numbers = #tpu.dot_dimension_numbers<[2], [2], [1], [1], [0, 0, 0, 1, 1, 1], [0], [0]>} : vector<1x8x128xbf16>, vector<1x8x128xbf16>, vector<1x8x8xf32> -> vector<1x8x8xf32>
    "tpu.trace_stop"() : () -> ()
    %c0_9 = arith.constant 0 : index
    %c0_10 = arith.constant 0 : index
    %c0_11 = arith.constant 0 : index
    %7 = vector.load %arg7[%c0_9, %c0_10, %c0_11] : memref<1x8x1xf32, #tpu.memory_space<vmem>>, vector<1x8x1xf32>
    %cst_12 = arith.constant dense<0xFF800000> : vector<1x8xf32>
    %8 = vector.multi_reduction <maximumf>, %6, %cst_12 [2] : vector<1x8x8xf32> to vector<1x8xf32>
    %9 = vector.shape_cast %8 : vector<1x8xf32> to vector<1x8x1xf32>
    %10 = arith.maximumf %7, %9 : vector<1x8x1xf32>
    %11 = arith.subf %7, %10 : vector<1x8x1xf32>
    %12 = math.exp %11 : vector<1x8x1xf32>
    %13 = vector.broadcast %10 : vector<1x8x1xf32> to vector<1x8x8xf32>
    %14 = arith.subf %6, %13 : vector<1x8x8xf32>
    %15 = math.exp %14 : vector<1x8x8xf32>
    %c0_13 = arith.constant 0 : index
    %c0_14 = arith.constant 0 : index
    %c0_15 = arith.constant 0 : index
    %16 = vector.load %arg8[%c0_13, %c0_14, %c0_15] : memref<1x8x1xf32, #tpu.memory_space<vmem>>, vector<1x8x1xf32>
    %17 = arith.mulf %12, %16 : vector<1x8x1xf32>
    %cst_16 = arith.constant dense<0.000000e+00> : vector<1x8xf32>
    %18 = vector.multi_reduction <add>, %15, %cst_16 [2] : vector<1x8x8xf32> to vector<1x8xf32>
    %19 = vector.shape_cast %18 : vector<1x8xf32> to vector<1x8x1xf32>
    %20 = arith.addf %17, %19 : vector<1x8x1xf32>
    %c0_17 = arith.constant 0 : index
    %c0_18 = arith.constant 0 : index
    %c0_19 = arith.constant 0 : index
    %21 = vector.load %arg8[%c0_17, %c0_18, %c0_19] : memref<1x8x1xf32, #tpu.memory_space<vmem>>, vector<1x8x1xf32>
    tpu.vector_store %arg8[%c0_17, %c0_18, %c0_19], %20 {strides = array<i32>} : memref<1x8x1xf32, #tpu.memory_space<vmem>>, vector<1x8x1xf32>,
    %c0_20 = arith.constant 0 : index
    %c0_21 = arith.constant 0 : index
    %c0_22 = arith.constant 0 : index
    %22 = vector.load %arg9[%c0_20, %c0_21, %c0_22] : memref<1x8x128xf32, #tpu.memory_space<vmem>>, vector<1x8x128xf32>
    %23 = vector.broadcast %12 : vector<1x8x1xf32> to vector<1x8x128xf32>
    %24 = arith.mulf %23, %22 : vector<1x8x128xf32>
    %25 = arith.truncf %15 : vector<1x8x8xf32> to vector<1x8x8xbf16>
    "tpu.trace_start"() <{level = 10 : i32, message = "bqk,bkd->bqd"}> : () -> ()
    %cst_23 = arith.constant dense<0.000000e+00> : vector<1x8x128xf32>
    %26 = tpu.matmul %25, %5, %cst_23 {dimension_numbers = #tpu.dot_dimension_numbers<[2], [1], [1], [2], [0, 0, 0, 1, 1, 2], [0], [0]>} : vector<1x8x8xbf16>, vector<1x8x128xbf16>, vector<1x8x128xf32> -> vector<1x8x128xf32>
    "tpu.trace_stop"() : () -> ()
    %27 = arith.addf %24, %26 : vector<1x8x128xf32>
    %c0_24 = arith.constant 0 : index
    %c0_25 = arith.constant 0 : index
    %c0_26 = arith.constant 0 : index
    %28 = vector.load %arg9[%c0_24, %c0_25, %c0_26] : memref<1x8x128xf32, #tpu.memory_space<vmem>>, vector<1x8x128xf32>
    tpu.vector_store %arg9[%c0_24, %c0_25, %c0_26], %27 {strides = array<i32>} : memref<1x8x128xf32, #tpu.memory_space<vmem>>, vector<1x8x128xf32>,
    %c0_27 = arith.constant 0 : index
    %c0_28 = arith.constant 0 : index
    %c0_29 = arith.constant 0 : index
    %29 = vector.load %arg7[%c0_27, %c0_28, %c0_29] : memref<1x8x1xf32, #tpu.memory_space<vmem>>, vector<1x8x1xf32>
    tpu.vector_store %arg7[%c0_27, %c0_28, %c0_29], %10 {strides = array<i32>} : memref<1x8x1xf32, #tpu.memory_space<vmem>>, vector<1x8x1xf32>,
    %c0_i32_30 = arith.constant 0 : i32
    %30 = arith.cmpi eq, %arg2, %c0_i32_30 : i32
    %31 = arith.extui %30 : i1 to i32
    %c0_i32_31 = arith.constant 0 : i32
    %32 = arith.cmpi ne, %31, %c0_i32_31 : i32
    scf.if %32 {
      %c0_32 = arith.constant 0 : index
      %c0_33 = arith.constant 0 : index
      %c0_34 = arith.constant 0 : index
      %33 = vector.load %arg8[%c0_32, %c0_33, %c0_34] : memref<1x8x1xf32, #tpu.memory_space<vmem>>, vector<1x8x1xf32>
      %34 = tpu.reciprocal %33 {approx = true} : vector<1x8x1xf32> -> vector<1x8x1xf32>
      %c0_35 = arith.constant 0 : index
      %c0_36 = arith.constant 0 : index
      %c0_37 = arith.constant 0 : index
      %35 = vector.load %arg9[%c0_35, %c0_36, %c0_37] : memref<1x8x128xf32, #tpu.memory_space<vmem>>, vector<1x8x128xf32>
      %36 = vector.broadcast %34 : vector<1x8x1xf32> to vector<1x8x128xf32>
      %37 = arith.mulf %35, %36 : vector<1x8x128xf32>
      %38 = arith.truncf %37 : vector<1x8x128xf32> to vector<1x8x128xbf16>
      %c0_38 = arith.constant 0 : index
      %c0_39 = arith.constant 0 : index
      %c0_40 = arith.constant 0 : index
      %39 = vector.load %arg5[%c0_38, %c0_39, %c0_40] : memref<1x8x128xbf16, #tpu.memory_space<vmem>>, vector<1x8x128xbf16>
      tpu.vector_store %arg5[%c0_38, %c0_39, %c0_40], %38 {strides = array<i32>} : memref<1x8x128xbf16, #tpu.memory_space<vmem>>, vector<1x8x128xbf16>,
    } else {
    }
    return
  }
  func.func @transform_0(%arg0: i32, %arg1: i32, %arg2: i32) -> (i32, i32, i32) {
    %c0_i32 = arith.constant 0 : i32
    %c0_i32_0 = arith.constant 0 : i32
    return %arg0, %arg1, %c0_i32 : i32, i32, i32
  }
  func.func @transform_1(%arg0: i32, %arg1: i32, %arg2: i32) -> (i32, i32, i32) {
    %c0_i32 = arith.constant 0 : i32
    %c0_i32_0 = arith.constant 0 : i32
    return %arg0, %arg2, %c0_i32 : i32, i32, i32
  }
  func.func @transform_2(%arg0: i32, %arg1: i32, %arg2: i32) -> (i32, i32, i32) {
    %c0_i32 = arith.constant 0 : i32
    %c0_i32_0 = arith.constant 0 : i32
    return %arg0, %arg1, %c0_i32 : i32, i32, i32
  }
}

</mosaic_0001>

<bundles_post_ra>
// kernel: tpu_custom_call.1
= control target key start
LH: loop header
LB: loop body
LE: loop exit
PB: predicated region body
PF: predicated region fallthrough
CT: control target
= control target key end

     0   :  { %7 = vsyncpa [#allocation7], 0  ;;  %s946_s0 = inlined_call_operand.hbm [shape: bf16[2,8,128], index: 0, kind: input, shape index: {}]   ;;  %s947_s1 = inlined_call_operand.hbm [shape: bf16[2,8,128], index: 1, kind: input, shape index: {}]   ;;  %s948_s2 = inlined_call_operand.hbm [shape: bf16[2,8,128], index: 2, kind: output, shape index: {}]  }
   0x1   :  { %9 = vsyncpa [#allocation7 + $0x1], 0 }
   0x2   :  { %10 = vsyncpa [#allocation10], 0 }
   0x3   :  { %12 = vsyncpa [#allocation10 + $0x1], 0 }
   0x4   :  { %13 = vsyncpa [#allocation8], 0 }
   0x5   :  { %15 = vsyncpa [#allocation8 + $0x1], 0  ;;  %s773_s9 = smov 0   ;;  %s775_s10 = smov 0  }
   0x6   :  { %s777_s11 = smov 0   ;;  %s779_s12 = smov 0  }
   0x7   :  { %s781_s13 = smov 0   ;;  %s783_s14 = smov 0  }
   0x8 LB: > { %s497_s15 = sadd.s32 4294967295, %s749_s14   ;;  %s498_s16 = sadd.s32 4294967294, %s749_s14   ;;  %s749_s14 = sphi %s783_s14, %s21_s14   ;;  %s745_s13 = sphi %s781_s13, %s960_s13   ;;  %s741_s12 = sphi %s779_s12, %s959_s12   ;;  %s737_s11 = sphi %s777_s11, %s958_s11   ;;  %s733_s10 = sphi %s775_s10, %s957_s10   ;;  %s729_s9 = sphi %s773_s9, %s956_s9  }
   0x9   : > { %s40_s17 = sadd.s32 1, %s745_s13  ;;  %s49_s18 = sadd.s32 1, %s737_s11 }
   0xa   : > { %p42_p0 = scmp.ge.s32.totalorder %s40_s17, 2  ;;  %p56_p1 = scmp.ne.s32.totalorder %s737_s11, %s733_s10 }
   0xb   : > { %p57_p2 = scmp.eq.s32.totalorder %s749_s14, 0  ;;  %p62_p3 = scmp.ne.s32.totalorder %s733_s10, %s729_s9 }
   0xc   : > { %s962_s17 = smov (%p42_p0, %s40_s17), 0  ;;  %p63_p5 = scmp.eq.s32.totalorder %s497_s15, 0 }
   0xd   : > { %p814_p4 = por %p57_p2, %p56_p1  ;;  %s44_s20 = ssub.s32 %s745_s13, %s962_s17 }
   0xe   : > { %p116_p6 = scmp.eq.s32.totalorder %s497_s15, 1  ;;  %p47_p7 = scmp.eq.s32.totalorder %s44_s20, 0 }
   0xf   : > { %p820_p8 = por %p63_p5, %p62_p3  ;;  %p122_p10 = scmp.eq.s32.totalorder %s498_s16, 1 }
  0x10   : > { %p824_p9 = por %p116_p6, %p56_p1  ;;  %p547_p13 = scmp.lt.s32.totalorder %s749_s14, 2 }
  0x11   : > { %s829_s23 = scalar_select %p47_p7, %s737_s11, %s49_s18  }
  0x12   : > { %p831_p11 = por %p122_p10, %p62_p3  ;;  %s838_s25 = sand.u32 1, %s737_s11  }
  0x13   : > { %s501_s26 = sshll.u32 %s838_s25, 2  ;;  %s502_s27 = sshll.u32 %s745_s13, 6 }
  0x14   : > { %s152_s30 = scalar_lea.hbm %s946_s0, %s502_s27  ;;  %s146_s3 = scalar_lea.vmem [#allocation6], %s501_s26 }
  0x15   : > { %s154_s4 = sshll.u32 %s146_s3, 4  ;;  %p847_p0 = pnand %p547_p13, %p814_p4  ;;  %s155_s4 = int_to_ptr.vmem [resolvable:$true] %s154_s4 }
  0x16   : > { %p505_p1 = scmp.ge.s32.totalorder %s749_s14, 1  ;;  %p178_p2 = scmp.lt.s32.totalorder %s749_s14, 3 }
  0x17   : > { %s143_s6 = scalar_lea.sflag [#allocation7], %s838_s25  ;;  %p611_p3 = pneg %p847_p0 }
  0x18   : > { %s622_s7 = scalar_lea.vmem %s155_s4, 64  ;;  %s751_s8 = smov [#allocation6]  }
  0x19   : > { %p623_p5 = scmp.ne.s32.totalorder %s155_s4, %s622_s7  ;;  %s627_s15 = sshll.u32 %s751_s8, 4  ;;  %s628_s15 = int_to_ptr.vmem [resolvable:$false] %s627_s15 }
  0x1a   : > { %s629_s16 = scalar_lea.vmem %s628_s15, 128  ;;  %p630_p4 = scmp.lt.s32.totalorder %s155_s4, %s628_s15 }
  0x1b   : > { %p625_p6 = pnand %p623_p5, %p611_p3  ;;  %p631_p10 = scmp.lt.s32.totalorder %s629_s16, %s622_s7 }
  0x1d   : > { %p626_p7 = pneg %p625_p6  ;;  %p632_p13 = por %p631_p10, %p630_p4 }
  0x1f   : > { %p633_p12 = pnand %p632_p13, %p626_p7 }
  0x21   : > { %636 = shalt.err (!%p633_p12)
}
  0x22   : > { %539 = dma.hbm_to_vmem [thread:$0]  (!%p847_p0), %s152_s30, 64, %s155_s4, %s143_s6  }
  0x23   : > { %p865_p5 = pnand %p505_p1, %p178_p2  ;;  %s171_s28 = scalar_lea.hbm %s947_s1, %s502_s27 }
  0x24   : > { %s165_s29 = scalar_lea.vmem [#allocation9], %s501_s26  ;;  %s162_s7 = scalar_lea.sflag [#allocation10], %s838_s25 }
  0x25   : > { %s173_s3 = sshll.u32 %s165_s29, 4  ;;  %s752_s30 = smov [#allocation9]   ;;  %s174_s3 = int_to_ptr.vmem [resolvable:$true] %s173_s3 }
  0x26   : > { %s650_s8 = scalar_lea.vmem %s174_s3, 64  ;;  %s655_s4 = sshll.u32 %s752_s30, 4  ;;  %s656_s4 = int_to_ptr.vmem [resolvable:$false] %s655_s4 }
  0x27   : > { %p651_p12 = scmp.ne.s32.totalorder %s174_s3, %s650_s8  ;;  %s657_s6 = scalar_lea.vmem %s656_s4, 128 }
  0x28   : > { %p658_p1 = scmp.lt.s32.totalorder %s174_s3, %s656_s4  ;;  %p659_p2 = scmp.lt.s32.totalorder %s657_s6, %s650_s8 }
  0x29   : > { %p653_p6 = pnand %p651_p12, %p611_p3 }
  0x2a   : > { %p660_p4 = por %p659_p2, %p658_p1 }
  0x2b   : > { %p654_p7 = pneg %p653_p6 }
  0x2d   : > { %p661_p10 = pnand %p660_p4, %p654_p7 }
  0x2f   : > { %664 = shalt.err (!%p661_p10)
}
  0x30   : > { %542 = dma.hbm_to_vmem [thread:$0]  (!%p847_p0), %s171_s28, 64, %s174_s3, %s162_s7  }
  0x31   : > { %182 = sbr.rel (%p865_p5) target bundleno = 849 (0x351), region = 28  ;;  %s881_s25 = sand.u32 (!%p865_p5), 1, %s733_s10  }
  0x32   : > { %s884_s26 = sshll.u32 (!%p865_p5), %s881_s25, 2  ;;  %s185_s27 = scalar_lea.sflag (!%p865_p5), [#allocation7], %s881_s25 }
  0x33   : > { %s188_s15 = scalar_lea.vmem (!%p865_p5), [#allocation6], %s884_s26 }
  0x36   : > { %716 = dma.done.wait (%p820_p8), %s185_s27, 64  }
  0x37   : > { %718 = vsyncadd (%p820_p8), %s185_s27, 4294967232  ;;  %s194_s5 = scalar_lea.sflag [#allocation10], %s881_s25  ;;  %s197_s16 = scalar_lea.vmem [#allocation9], %s884_s26 }
  0x38   : > { %720 = dma.done.wait (%p820_p8), %s194_s5, 64  }
  0x39   : > { %722 = vsyncadd (%p820_p8), %s194_s5, 4294967232  ;;  %vm232_vm0 = vcmask 7168   ;;  %v753_v0 = vmov 0.0   ;;  %vm754_vm1 = vmmov 0   ;;  %v237_v1 = vld [vmem:[%s197_s16] sm:$0xf] }
  0x3a   : > { %234 = vst.msk [vmem:[#allocation4] sm:$0xff] %vm232_vm0, %v753_v0  ;;  %518 = vmatprep.subr.bf16.mxu0 %v753_v0  ;;  %520 = vmatprep.mubr.msk.bf16.mxu0 %vm754_vm1, %v753_v0  ;;  %v229_v2 = vld [vmem:[%s188_s15] sm:$0xf]  ;;  %v755_v5 = vmov -inf   ;;  %vm279_vm2 = vcmask 64512   ;;  %v756_v11 = vmov 0  }
  0x3b   : > { %524 = vmatprep.subr.bf16.mxu1 %v753_v0  ;;  %526 = vmatprep.mubr.msk.bf16.mxu1 %vm754_vm1, %v753_v0  ;;  %v230_v3 = vmul.bf16 1043676725, %v229_v2  ;;  %233 = vst.msk [vmem:[#allocation3] sm:$0xff] %vm232_vm0, %v755_v5  ;;  %vm314_vm3 = vcmask 1043456   ;;  %s511_s21 = sshll.u32 %s741_s12, 6  ;;  %s222_s18 = scalar_lea.vmem [#allocation11], %s884_s26 }
  0x3c   : > { %519 = vmatpush3.bf16.xpose.msra.mxu0 %v237_v1  ;;  %601 = vset.pattern.permute.xlu0 %v756_v11  ;;  %v316_v16 = vsel %vm314_vm3, %v237_v1, 0  ;;  %s390_s19 = sshll.u32 %s222_s18, 4  ;;  %s388_s29 = scalar_lea.hbm %s948_s2, %s511_s21  ;;  %s391_s19 = int_to_ptr.vmem [resolvable:$true] %s390_s19 }
  0x3d   : > { %231 = vst [vmem:[#allocation2] sm:$0xf] %v230_v3  ;;  %602 = vset.pattern.permute.xlu1 %v756_v11  ;;  %525 = vmatpush3.bf16.msra.mxu1 %v316_v16  ;;  %s376_s3 = scalar_lea.sflag [#allocation8], %s881_s25  ;;  %s665_s7 = scalar_lea.vmem %s391_s19, 64 }
  0x3e   : > { %p666_p8 = scmp.ne.s32.totalorder %s391_s19, %s665_s7  ;;  %s757_s8 = smov [#allocation11]  }
  0x3f   : > { %s669_s30 = sshll.u32 %s757_s8, 4  ;;  %s670_s30 = int_to_ptr.vmem [resolvable:$false] %s669_s30 }
  0x40   : > { %p667_p0 = pnand %p666_p8, %p824_p9  ;;  %s671_s12 = scalar_lea.vmem %s670_s30, 128 }
  0x41   : > { %v295_v25 = vld [vmem:[#allocation4] sm:$0xff]  ;;  %p672_p13 = scmp.lt.s32.totalorder %s391_s19, %s670_s30  ;;  %p673_p5 = scmp.lt.s32.totalorder %s671_s12, %s665_s7 }
  0x42   : > { %v278_v12 = vld [vmem:[#allocation3] sm:$0xff]  ;;  %p668_p3 = pneg %p667_p0 }
  0x43   : > { %p674_p12 = por %p673_p5, %p672_p13 }
  0x44   : > { %v236_v4 = vld [vmem:[#allocation2] sm:$0xf] }
  0x45   : > { %521 = vmatmul.mubr.bf16.vlgmr.msra.gmra.mxu0 %v236_v4  ;;  %p675_p6 = pnand %p674_p12, %p668_p3 }
 0x105   : > { %v272_v6 = vpop.f32.mrf.mxu0 }
 0x106   : > { %v280_v7 = vsel %vm279_vm2, %v272_v6, -inf }
 0x107   : > { %281 = vmax.xlane.f32.xlu0 %v280_v7  ;;  %v522_v8 = vpop.f32.mrf.mxu0 }
 0x109   : > { %v275_v9 = vpop.f32.mrf.mxu0 }
 0x10b   : > { %v523_v10 = vpop.f32.mrf.mxu0 }
 0x190   : > { %v282_v13 = vpop.xlane.xlu0 %281 }
 0x191   : > { %v283_v14 = vmax.f32 %v278_v12, %v282_v13 }
 0x193   : > { %v284_v15 = vsub.f32 %v278_v12, %v283_v14  ;;  %360 = vst.msk [vmem:[#allocation3] sm:$0xff] %vm232_vm0, %v283_v14  ;;  %289 = vperm.xlu0 %601, %v283_v14  }
 0x195   : > { %v285_v21 = vmul.f32 1.442695, %v284_v15 }
 0x20e   : > { %v290_v17 = vpop.permute.xlu0 %289 }
 0x20f   : > { %v292_v18 = vsub.f32 %v272_v6, %v290_v17 }
 0x211   : > { %v293_v19 = vmul.f32 1.442695, %v292_v18 }
 0x213   : > { %603 = vpow2.f32 %v293_v19 }
 0x214   : > { %605 = vpow2.f32 %v285_v21 }
 0x220   : > { %v604_v20 = vpop.eup %603 }
 0x221   : > { %v297_v22 = vsel %vm279_vm2, %v604_v20, 0.0  ;;  %v310_v23 = vpack.c.bf16 %v604_v20, %v604_v20  ;;  %v606_v24 = vpop.eup %605 }
 0x222   : > { %298 = vadd.xlane.f32.xlu1 %v297_v22  ;;  %v296_v26 = vmul.f32 %v606_v24, %v295_v25 }
 0x223   : > { %527 = vmatmul.mubr.msk.bf16.vlgmr.msra.gmra.mxu1 %vm279_vm2, %v310_v23 }
 0x233   : > { %306 = vperm.xlu1 %602, %v606_v24  }
 0x2ab   : > { %v299_v27 = vpop.xlane.xlu1 %298 }
 0x2ac   : > { %v300_v28 = vadd.f32 %v299_v27, %v296_v26 }
 0x2ae   : > { %302 = vst.msk [vmem:[#allocation4] sm:$0xff] %vm232_vm0, %v300_v28 }
 0x2af   : > { %v307_v35 = vpop.permute.xlu1 %306 }
 0x2b0   : > { %v309_v36 = vmul.f32 0.0, %v307_v35 }
 0x2b5   : > { %v364_v29 = vld [vmem:[#allocation4] sm:$0xff] }
 0x2b6   : > { %607 = vrcp.f32 %v364_v29 }
 0x2c3   : > { %v608_v30 = vpop.eup %607 }
 0x2c4   : > { %369 = vperm.xlu1 %602, %v608_v30  }
 0x2e3   : > { %v352_v31 = vpop.f32.mrf.mxu1 }
 0x2e4   : > { %v358_v37 = vadd.f32 %v352_v31, %v309_v36 }
 0x2e5   : > { %v528_v32 = vpop.f32.mrf.mxu1 }
 0x2e7   : > { %v355_v33 = vpop.f32.mrf.mxu1 }
 0x2e9   : > { %v529_v34 = vpop.f32.mrf.mxu1 }
 0x33f   : > { %v370_v38 = vpop.permute.xlu1 %369 }
 0x340   : > { %v372_v39 = vmul.f32 %v370_v38, %v358_v37 }
 0x342   : > { %v373_v40 = vpack.c.bf16 %v372_v39, %v372_v39 }
 0x344   : > { %374 = vst [vmem:[%s222_s18] sm:$0xf] %v373_v40 }
 0x345   : > { %678 = shalt.err (!%p675_p6)
}
 0x346   : > { %s679_s4 = scalar_lea.hbm %s388_s29, 64  ;;  %s683_s26 = scalar_lea.hbm %s948_s2, 128 }
 0x347   : > { %p680_p7 = scmp.ne.s32.totalorder %s388_s29, %s679_s4  ;;  %p684_p4 = scmp.lt.s32.totalorder %s388_s29, %s948_s2 }
 0x348   : > { %p685_p10 = scmp.lt.s32.totalorder %s683_s26, %s679_s4 }
 0x349   : > { %p681_p1 = pnand %p680_p7, %p824_p9 }
 0x34a   : > { %p686_p8 = por %p685_p10, %p684_p4 }
 0x34b   : > { %p682_p2 = pneg %p681_p1 }
 0x34d   : > { %p687_p0 = pnand %p686_p8, %p682_p2 }
 0x34f   : > { %690 = shalt.err (!%p687_p0)
}
 0x350   : > { %534 = dma.vmem_to_hbm [thread:$0]  (%p824_p9), %s391_s19, 64, %s388_s29, %s376_s3  }
 0x351 PF: > { %s402_s5 = sand.u32 1, %s729_s9   ;;  %p955_p3 = scmp.ge.s32.totalorder %s749_s14, 2 }
 0x352   : > { %s403_s16 = scalar_lea.sflag [#allocation8], %s402_s5 }
 0x353   : > { %p544_p13 = pnand %p955_p3, %p831_p11 }
 0x355   : > { %p545_p5 = pneg %p544_p13 }
 0x357   : > { %724 = dma.done.wait (%p545_p5), %s403_s16, 64  }
 0x358   : > { %726 = vsyncadd (%p545_p5), %s403_s16, 4294967232  ;;  %s21_s14 = sadd.s32 1, %s749_s14   ;;  %s956_s9 = smov %s733_s10 }
 0x359   : > { %p18_p12 = scmp.ge.s32.totalorder %s21_s14, 4   ;;  %s957_s10 = smov %s737_s11 }
 0x35a   : > { %s958_s11 = smov %s829_s23  ;;  %s959_s12 = smov %s745_s13 }
 0x35b   : > { %s960_s13 = smov %s962_s17  ;;  %20 = sbr.rel (!%p18_p12) target bundleno = 8 (0x8), region = 94 }
 0x360   :  { %408 = vsyncpa [#allocation7], 1 }
 0x361   :  { %410 = vsyncpa [#allocation7 + $0x1], 1 }
 0x362   :  { %411 = vsyncpa [#allocation10], 1 }
 0x363   :  { %413 = vsyncpa [#allocation10 + $0x1], 1 }
 0x364   :  { %414 = vsyncpa [#allocation8], 1 }
 0x365   :  { %416 = vsyncpa [#allocation8 + $0x1], 1 }

</bundles_post_ra>
